<compile_context>
chip_gen: v6e
topology: v6e:2x2x1
jax: 0.10.0
libtpu: 0.0.40
codegen_flags: <defaults>
</compile_context>

<pallas_src>
import jax
import jax.numpy as jnp
from jax import lax
from jax.experimental import pallas as pl
from jax.experimental.pallas import tpu as pltpu


def _round_up(a, b):
    return -(-a // b) * b


def _linear_nobias_kernel(x_ref, w_ref, o_ref):
    # x_ref: (tm, K)   activations
    # w_ref: (tn, K)   weight tile, PyTorch (num_classes, feat_dim) layout
    # o_ref: (tm, tn)  output logits tile
    o_ref[...] = lax.dot_general(
        x_ref[...],
        w_ref[...],
        dimension_numbers=(((1,), (1,)), ((), ())),
        preferred_element_type=jnp.float32,
    ).astype(o_ref.dtype)


def _linear_nobias_acc_kernel(x_ref, w_ref, o_ref, acc_ref):
    # K-tiled variant: accumulate partial products in an f32 VMEM scratch and
    # store once on the last K step.
    @pl.when(pl.program_id(2) == 0)
    def _():
        acc_ref[...] = jnp.zeros_like(acc_ref)

    acc_ref[...] += lax.dot_general(
        x_ref[...],
        w_ref[...],
        dimension_numbers=(((1,), (1,)), ((), ())),
        preferred_element_type=jnp.float32,
    )

    @pl.when(pl.program_id(2) == pl.num_programs(2) - 1)
    def _():
        o_ref[...] = acc_ref[...].astype(o_ref.dtype)


def dot_product_classifier(x, weight, *, tm=None, tn=None, tk=None,
                           vmem_limit_bytes=32 * 1024 * 1024):
    """Forward pass of DotProduct_Classifier: out = x @ weight.T

    x:      (B, feat_dim)
    weight: (num_classes, feat_dim)  -- PyTorch nn.Linear layout (NOT transposed)
    returns (B, num_classes)
    """
    B, K = x.shape
    N, K2 = weight.shape
    if K != K2:
        raise ValueError(f"feat_dim mismatch: x has {K}, weight has {K2}")

    out_dtype = x.dtype
    x_item = jnp.dtype(x.dtype).itemsize
    w_item = jnp.dtype(weight.dtype).itemsize
    o_item = jnp.dtype(out_dtype).itemsize

    budget = vmem_limit_bytes - (4 << 20)   # headroom for the compiler

    def _bytes(tm_, tn_, tk_):
        # double-buffered input tiles + double-buffered output tile + f32 acc
        return (2 * (tm_ * tk_ * x_item + tn_ * tk_ * w_item)
                + 2 * tm_ * tn_ * o_item
                + tm_ * tn_ * 4)

    # --- tile selection -------------------------------------------------------
    # tm: cover the whole batch when classifier-sized (weight read ~once),
    #     otherwise tile at 256 rows.  Always a multiple of 8 (sublane).
    if tm is None:
        tm = _round_up(B, 8) if B <= 256 else 256
    # tn: lane-dense multiple of 128; 512 default for large class counts.
    if tn is None:
        tn = _round_up(N, 128) if N <= 512 else 512
    # tk: full K when it fits in VMEM (fast path, no accumulator); otherwise the
    #     largest power-of-two multiple of 128 that fits (adds no HBM traffic).
    if tk is None:
        if _bytes(tm, tn, K) <= budget:
            tk = K
        else:
            tk = 128
            while tk * 2 <= _round_up(K, 128) and _bytes(tm, tn, tk * 2) <= budget:
                tk *= 2
    k_tiled = tk < K
    tk_eff = tk if k_tiled else K

    # Last resort if even tk=128 (or the user's tk) blows the budget: shrink tn,
    # then tm.  This trades some re-reads for fitting VMEM.
    while _bytes(tm, tn, tk_eff) > budget and tn > 128 and (tn // 2) % 128 == 0:
        tn //= 2
    while _bytes(tm, tn, tk_eff) > budget and tm > 8 and (tm // 2) % 8 == 0:
        tm //= 2

    # --- padding for non-divisible shapes -------------------------------------
    B_pad = _round_up(B, tm)
    N_pad = _round_up(N, tn)
    K_pad = _round_up(K, tk) if k_tiled else K

    if B_pad != B or K_pad != K:
        x = jnp.pad(x, ((0, B_pad - B), (0, K_pad - K)))
    if N_pad != N or K_pad != K:
        weight = jnp.pad(weight, ((0, N_pad - N), (0, K_pad - K)))

    cost = pl.CostEstimate(
        flops=2 * B_pad * N_pad * K_pad,
        transcendentals=0,
        bytes_accessed=(B_pad * K_pad * x_item * (N_pad // tn)
                        + N_pad * K_pad * w_item * (B_pad // tm)
                        + B_pad * N_pad * o_item),
    )

    if not k_tiled:
        grid = (B_pad // tm, N_pad // tn)
        out = pl.pallas_call(
            _linear_nobias_kernel,
            out_shape=jax.ShapeDtypeStruct((B_pad, N_pad), out_dtype),
            grid_spec=pltpu.PrefetchScalarGridSpec(
                num_scalar_prefetch=0,
                grid=grid,
                in_specs=[
                    pl.BlockSpec((tm, K_pad), lambda i, j: (i, 0)),  # x, full K
                    pl.BlockSpec((tn, K_pad), lambda i, j: (j, 0)),  # W (N,K), full K
                ],
                out_specs=pl.BlockSpec((tm, tn), lambda i, j: (i, j)),
            ),
            compiler_params=pltpu.CompilerParams(
                dimension_semantics=("parallel", "parallel"),
                vmem_limit_bytes=vmem_limit_bytes,
            ),
            cost_estimate=cost,
        )(x, weight)
    else:
        grid = (B_pad // tm, N_pad // tn, K_pad // tk)
        out = pl.pallas_call(
            _linear_nobias_acc_kernel,
            out_shape=jax.ShapeDtypeStruct((B_pad, N_pad), out_dtype),
            grid_spec=pltpu.PrefetchScalarGridSpec(
                num_scalar_prefetch=0,
                grid=grid,
                in_specs=[
                    pl.BlockSpec((tm, tk), lambda i, j, k: (i, k)),
                    pl.BlockSpec((tn, tk), lambda i, j, k: (j, k)),
                ],
                out_specs=pl.BlockSpec((tm, tn), lambda i, j, k: (i, j)),
                scratch_shapes=[pltpu.VMEM((tm, tn), jnp.float32)],
            ),
            compiler_params=pltpu.CompilerParams(
                dimension_semantics=("parallel", "parallel", "arbitrary"),
                vmem_limit_bytes=vmem_limit_bytes,
            ),
            cost_estimate=cost,
        )(x, weight)

    if B_pad != B or N_pad != N:
        out = out[:B, :N]
    return out

    # TODO(synk): optional bf16 weight/activation cast halves HBM traffic on
    # v5e/v6e/v7x but loosens the 1e-4 logits tolerance, so it is left off here.


if __name__ == "__main__":
    # Small shapes consistent with the module.
    B, FEAT_DIM, NUM_CLASSES = 8, 256, 128

    key = jax.random.PRNGKey(0)
    kx, kw = jax.random.split(key)

    x = jax.random.normal(kx, (B, FEAT_DIM), dtype=jnp.float32)
    # nn.Linear weight init, PyTorch layout (num_classes, feat_dim).
    bound = 1.0 / (FEAT_DIM ** 0.5)
    weight = jax.random.uniform(
        kw, (NUM_CLASSES, FEAT_DIM), dtype=jnp.float32, minval=-bound, maxval=bound
    )

    # 1) Fast path (full-K blocks, 2D grid).
    out = jax.block_until_ready(dot_product_classifier(x, weight))
    ref = x @ weight.T
    assert out.shape == (B, NUM_CLASSES)
    assert jnp.allclose(out, ref, atol=1e-4, rtol=1e-4)

    # 2) Ragged shapes (non multiple of 8/128) exercise the padding path.
    B2, FEAT2, NCLS2 = 12, 96, 200
    k2x, k2w = jax.random.split(jax.random.PRNGKey(1))
    x2 = jax.random.normal(k2x, (B2, FEAT2), dtype=jnp.float32)
    w2 = jax.random.normal(k2w, (NCLS2, FEAT2), dtype=jnp.float32) * 0.02
    out2 = jax.block_until_ready(dot_product_classifier(x2, w2))
    ref2 = x2 @ w2.T
    assert out2.shape == (B2, NCLS2)
    assert jnp.allclose(out2, ref2, atol=1e-4, rtol=1e-4)

    # 3) Forced K tiling (tk < K) exercises the accumulator path cheaply.
    out3 = jax.block_until_ready(dot_product_classifier(x, weight, tk=128))
    assert out3.shape == (B, NUM_CLASSES)
    assert jnp.allclose(out3, ref, atol=1e-4, rtol=1e-4)

    # 4) Module-default sized head (feat_dim=2048, num_classes=1000) at tiny B.
    B4 = 4
    k4x, k4w = jax.random.split(jax.random.PRNGKey(2))
    x4 = jax.random.normal(k4x, (B4, 2048), dtype=jnp.float32)
    bound4 = 1.0 / (2048.0 ** 0.5)
    w4 = jax.random.uniform(k4w, (1000, 2048), dtype=jnp.float32,
                            minval=-bound4, maxval=bound4)
    out4 = jax.block_until_ready(dot_product_classifier(x4, w4))
    ref4 = x4 @ w4.T
    assert out4.shape == (B4, 1000)
    assert jnp.allclose(out4, ref4, atol=2e-4, rtol=1e-4)

    print("KERNEL_OK")
</pallas_src>

<mosaic_0001>
module attributes {stable_mosaic.version = 11 : i64} {
  func.func @_linear_nobias_kernel(%arg0: i32, %arg1: i32, %arg2: memref<8x256xf32, #tpu.memory_space<vmem>>, %arg3: memref<128x256xf32, #tpu.memory_space<vmem>>, %arg4: memref<8x128xf32, #tpu.memory_space<vmem>>) attributes {dimension_semantics = [#tpu.dimension_semantics<parallel>, #tpu.dimension_semantics<parallel>], iteration_bounds = array<i64: 1, 1>, scalar_prefetch = 0 : i64, scratch_operands = 0 : i64, tpu.core_type = #tpu.core_type<tc>, window_params = [{transform_indices = @transform_0, window_bounds = array<i64: 8, 256>}, {transform_indices = @transform_1, window_bounds = array<i64: 128, 256>}, {transform_indices = @transform_2, window_bounds = array<i64: 8, 128>}]} {
    %c0 = arith.constant 0 : index
    %c0_0 = arith.constant 0 : index
    %0 = vector.load %arg2[%c0, %c0_0] : memref<8x256xf32, #tpu.memory_space<vmem>>, vector<8x256xf32>
    %c0_1 = arith.constant 0 : index
    %c0_2 = arith.constant 0 : index
    %1 = vector.load %arg3[%c0_1, %c0_2] : memref<128x256xf32, #tpu.memory_space<vmem>>, vector<128x256xf32>
    %cst = arith.constant dense<0.000000e+00> : vector<8x128xf32>
    %2 = tpu.matmul %0, %1, %cst {dimension_numbers = #tpu.dot_dimension_numbers<[1], [1], [0], [0], [0, 0, 1, 0], [], []>} : vector<8x256xf32>, vector<128x256xf32>, vector<8x128xf32> -> vector<8x128xf32>
    %c0_3 = arith.constant 0 : index
    %c0_4 = arith.constant 0 : index
    %3 = vector.load %arg4[%c0_3, %c0_4] : memref<8x128xf32, #tpu.memory_space<vmem>>, vector<8x128xf32>
    tpu.vector_store %arg4[%c0_3, %c0_4], %2 {strides = array<i32>} : memref<8x128xf32, #tpu.memory_space<vmem>>, vector<8x128xf32>,
    return
  }
  func.func @transform_0(%arg0: i32, %arg1: i32) -> (i32, i32) {
    %c0_i32 = arith.constant 0 : i32
    %c0_i32_0 = arith.constant 0 : i32
    return %arg0, %c0_i32 : i32, i32
  }
  func.func @transform_1(%arg0: i32, %arg1: i32) -> (i32, i32) {
    %c0_i32 = arith.constant 0 : i32
    %c0_i32_0 = arith.constant 0 : i32
    return %arg1, %c0_i32 : i32, i32
  }
  func.func @transform_2(%arg0: i32, %arg1: i32) -> (i32, i32) {
    %c0_i32 = arith.constant 0 : i32
    return %arg0, %arg1 : i32, i32
  }
}

</mosaic_0001>

<bundles_post_ra>
// kernel: tpu_custom_call.1
= control target key start
LH: loop header
LB: loop body
LE: loop exit
PB: predicated region body
PF: predicated region fallthrough
CT: control target
= control target key end

     0   :  { %7 = vsyncpa [#allocation3], 0  ;;  %s259_s0 = inlined_call_operand.hbm [shape: f32[8,256], index: 0, kind: input, shape index: {}]   ;;  %s260_s1 = inlined_call_operand.hbm [shape: f32[128,256], index: 1, kind: input, shape index: {}]   ;;  %s261_s2 = inlined_call_operand.hbm [shape: f32[8,128], index: 2, kind: output, shape index: {}]  }
   0x1   :  { %8 = vsyncpa [#allocation6], 0 }
   0x2   :  { %9 = vsyncpa [#allocation4], 0  ;;  %s230_s9 = smov [#allocation2]   ;;  %s231_s11 = smov [#allocation5]  }
   0x3   :  { %s16_s10 = sshll.u32 %s230_s9, 4  ;;  %s25_s12 = sshll.u32 %s231_s11, 4  ;;  %s17_s10 = int_to_ptr.vmem [resolvable:$true] %s16_s10  ;;  %s26_s12 = int_to_ptr.vmem [resolvable:$true] %s25_s12 }
   0x4   :  { %s172_s13 = scalar_lea.vmem %s17_s10, 256  ;;  %p177_p1 = scmp.lt.s32.totalorder %s17_s10, %s17_s10 }
   0x5   :  { %p173_p0 = scmp.ne.s32.totalorder %s17_s10, %s172_s13  ;;  %p178_p2 = scmp.lt.s32.totalorder %s172_s13, %s172_s13 }
   0x7   :  { %p179_p3 = por %p178_p2, %p177_p1 }
   0x9   :  { %p180_p4 = pnand %p179_p3, %p173_p0 }
   0xb   :  { %183 = shalt.err (!%p180_p4)
}
   0xc   :  { %19 = dma.hbm_to_vmem [thread:$0]  %s259_s0, 256, %s17_s10, [#allocation3]  }
   0xd   :  { %s192_s16 = scalar_lea.vmem %s26_s12, 4096  ;;  %p197_p6 = scmp.lt.s32.totalorder %s26_s12, %s26_s12 }
   0xe   :  { %p193_p5 = scmp.ne.s32.totalorder %s26_s12, %s192_s16  ;;  %p198_p7 = scmp.lt.s32.totalorder %s192_s16, %s192_s16 }
  0x10   :  { %p199_p8 = por %p198_p7, %p197_p6 }
  0x12   :  { %p200_p9 = pnand %p199_p8, %p193_p5 }
  0x14   :  { %203 = shalt.err (!%p200_p9)
}
  0x15   :  { %s232_s17 = smov 256   ;;  %s233_s18 = smov 16  }
  0x16   :  { %31 = dma.hbm_to_vmem [thread:$0]  %s260_s1, 4096, %s26_s12, [#allocation6], %s232_s17, %s232_s17, %s233_s18  }
  0x17   :  { %224 = dma.done.wait [#allocation3], 256  }
  0x18   :  { %225 = vsyncadd [#allocation3], 4294967040 }
  0x19   :  { %226 = dma.done.wait [#allocation6], 4096  }
  0x1a   :  { %227 = vsyncadd [#allocation6], 4294963200  ;;  %v71_v0 = vld [vmem:[#allocation5 + $0xf8] sm:$0xff]  ;;  %v70_v1 = vld [vmem:[#allocation5 + $0xf0] sm:$0xff]  ;;  %s234_s0 = smov [#allocation7]  }
  0x1b   :  { %v69_v2 = vld [vmem:[#allocation5 + $0xe8] sm:$0xff]  ;;  %72 = vmatprep.subr.mxu0 %v71_v0  ;;  %v68_v3 = vld [vmem:[#allocation5 + $0xe0] sm:$0xff]  ;;  %v67_v4 = vld [vmem:[#allocation5 + $0xd8] sm:$0xff]  ;;  %s149_s1 = sshll.u32 %s234_s0, 4  ;;  %s150_s1 = int_to_ptr.vmem [resolvable:$true] %s149_s1 }
  0x1c   :  { %73 = vmatpush1.xpose.msra.mxu0 %v70_v1  ;;  %v66_v5 = vld [vmem:[#allocation5 + $0xd0] sm:$0xff]  ;;  %v65_v6 = vld [vmem:[#allocation5 + $0xc8] sm:$0xff]  ;;  %v39_v7 = vld [vmem:[#allocation2 + $0x8] sm:$0xff]  ;;  %s204_s21 = scalar_lea.vmem %s150_s1, 128  ;;  %p209_p11 = scmp.lt.s32.totalorder %s150_s1, %s150_s1 }
  0x1d   :  { %74 = vmatprep.subr.mxu0 %v69_v2  ;;  %v64_v8 = vld [vmem:[#allocation5 + $0xc0] sm:$0xff]  ;;  %136 = vmatprep.mubr.f32.mxu0 %v39_v7  ;;  %v63_v9 = vld [vmem:[#allocation5 + $0xb8] sm:$0xff]  ;;  %v62_v10 = vld [vmem:[#allocation5 + $0xb0] sm:$0xff]  ;;  %p205_p10 = scmp.ne.s32.totalorder %s150_s1, %s204_s21  ;;  %p210_p12 = scmp.lt.s32.totalorder %s204_s21, %s204_s21 }
  0x1e   :  { %v61_v11 = vld [vmem:[#allocation5 + $0xa8] sm:$0xff]  ;;  %v60_v12 = vld [vmem:[#allocation5 + $0xa0] sm:$0xff]  ;;  %v59_v13 = vld [vmem:[#allocation5 + $0x98] sm:$0xff] }
  0x1f   :  { %v58_v14 = vld [vmem:[#allocation5 + $0x90] sm:$0xff]  ;;  %v57_v15 = vld [vmem:[#allocation5 + $0x88] sm:$0xff]  ;;  %v56_v16 = vld [vmem:[#allocation5 + $0x80] sm:$0xff]  ;;  %p211_p13 = por %p210_p12, %p209_p11 }
  0x20   :  { %75 = vmatpush1.xpose.msra.mxu0 %v68_v3  ;;  %v55_v17 = vld [vmem:[#allocation5 + $0x78] sm:$0xff]  ;;  %v54_v18 = vld [vmem:[#allocation5 + $0x70] sm:$0xff]  ;;  %v53_v19 = vld [vmem:[#allocation5 + $0x68] sm:$0xff] }
  0x21   :  { %76 = vmatprep.subr.mxu0 %v67_v4  ;;  %v52_v20 = vld [vmem:[#allocation5 + $0x60] sm:$0xff]  ;;  %v51_v21 = vld [vmem:[#allocation5 + $0x58] sm:$0xff]  ;;  %v50_v22 = vld [vmem:[#allocation5 + $0x50] sm:$0xff]  ;;  %p212_p0 = pnand %p211_p13, %p205_p10 }
  0x22   :  { %v49_v23 = vld [vmem:[#allocation5 + $0x48] sm:$0xff]  ;;  %v48_v24 = vld [vmem:[#allocation5 + $0x40] sm:$0xff]  ;;  %v47_v25 = vld [vmem:[#allocation5 + $0x38] sm:$0xff] }
  0x23   :  { %v46_v26 = vld [vmem:[#allocation5 + $0x30] sm:$0xff]  ;;  %v45_v27 = vld [vmem:[#allocation5 + $0x28] sm:$0xff]  ;;  %v44_v28 = vld [vmem:[#allocation5 + $0x20] sm:$0xff] }
  0x24   :  { %77 = vmatpush1.xpose.msra.mxu0 %v66_v5  ;;  %v43_v29 = vld [vmem:[#allocation5 + $0x18] sm:$0xff]  ;;  %v42_v30 = vld [vmem:[#allocation5 + $0x10] sm:$0xff]  ;;  %v41_v31 = vld [vmem:[#allocation5 + $0x8] sm:$0xff] }
  0x25   :  { %78 = vmatprep.subr.mxu0 %v65_v6  ;;  %v40_v32 = vld [vmem:[#allocation5] sm:$0xff]  ;;  %v38_v33 = vld [vmem:[#allocation2] sm:$0xff] }
  0x28   :  { %79 = vmatpush1.xpose.msra.mxu0 %v64_v8 }
  0x29   :  { %80 = vmatprep.subr.mxu0 %v63_v9 }
  0x2c   :  { %81 = vmatpush1.xpose.msra.mxu0 %v62_v10 }
  0x2d   :  { %82 = vmatprep.subr.mxu0 %v61_v11 }
  0x30   :  { %83 = vmatpush1.xpose.msra.mxu0 %v60_v12 }
  0x31   :  { %84 = vmatprep.subr.mxu0 %v59_v13 }
  0x34   :  { %85 = vmatpush1.xpose.msra.mxu0 %v58_v14 }
  0x35   :  { %86 = vmatprep.subr.mxu0 %v57_v15 }
  0x38   :  { %87 = vmatpush1.xpose.msra.mxu0 %v56_v16 }
  0x39   :  { %88 = vmatprep.subr.mxu0 %v55_v17 }
  0x3c   :  { %89 = vmatpush1.xpose.msra.mxu0 %v54_v18 }
  0x3d   :  { %90 = vmatprep.subr.mxu0 %v53_v19 }
  0x40   :  { %91 = vmatpush1.xpose.msra.mxu0 %v52_v20 }
  0x41   :  { %92 = vmatprep.subr.mxu0 %v51_v21 }
  0x44   :  { %93 = vmatpush1.xpose.msra.mxu0 %v50_v22 }
  0x45   :  { %94 = vmatprep.subr.mxu0 %v49_v23 }
  0x48   :  { %95 = vmatpush1.xpose.msra.mxu0 %v48_v24 }
  0x49   :  { %96 = vmatprep.subr.mxu0 %v47_v25 }
  0x4c   :  { %97 = vmatpush1.xpose.msra.mxu0 %v46_v26 }
  0x4d   :  { %98 = vmatprep.subr.mxu0 %v45_v27 }
  0x50   :  { %99 = vmatpush1.xpose.msra.mxu0 %v44_v28 }
  0x51   :  { %100 = vmatprep.subr.mxu0 %v43_v29 }
  0x54   :  { %101 = vmatpush1.xpose.msra.mxu0 %v42_v30 }
  0x55   :  { %102 = vmatprep.subr.mxu0 %v41_v31 }
  0x58   :  { %103 = vmatpush1.xpose.msra.mxu0 %v40_v32 }
  0x5b   :  { %137 = vmatmul.mubr.f32.vlgmr.msra.gmra.mxu0 %v38_v33 }
 0x11b   :  { %v138_v34 = vpop.f32.mrf.mxu0 }
 0x11c   :  { %142 = vst [vmem:[#allocation7] sm:$0xff] %v138_v34 }
 0x11d   :  { %v140_v35 = vpop.f32.mrf.mxu0 }
 0x11e   :  { %215 = shalt.err (!%p212_p0)
}
 0x11f   :  { %152 = dma.vmem_to_hbm [thread:$0]  %s150_s1, 128, %s261_s2, [#allocation4]  }
 0x120   :  { %228 = dma.done.wait [#allocation4], 128  }
 0x121   :  { %229 = vsyncadd [#allocation4], 4294967168 }
 0x122   :  { %156 = vsyncpa [#allocation3], 1 }
 0x123   :  { %157 = vsyncpa [#allocation6], 1 }
 0x124   :  { %158 = vsyncpa [#allocation4], 1 }

</bundles_post_ra>
